<compile_context>
chip_gen: v7x
topology: tpu7x:2x2x1
jax: 0.10.0
libtpu: 0.0.40
codegen_flags: <defaults>
</compile_context>

<pallas_src>
import functools
from typing import NamedTuple, Tuple

import numpy as np
import jax
import jax.numpy as jnp
from jax.experimental import pallas as pl
from jax.experimental.pallas import tpu as pltpu


def _round_up(x, m):
    return ((x + m - 1) // m) * m


def _pad_feature_dim(d):
    # Dims <= 128 (or already lane-aligned) stay as-is: a full-extent block is
    # legal and avoids inflating traffic/compute for tiny feature dims.
    if d <= 128 or d % 128 == 0:
        return d
    return _round_up(d, 128)


class PreppedMLP(NamedTuple):
    layers: Tuple   # tuple of (w (Din_p, Dout_p), b (1, Dout_p))
    dim_in: int     # true (unpadded) input feature dim
    dim_out: int    # true (unpadded) output feature dim


def prepare_multimodel_params(params, *, weight_dtype=jnp.bfloat16):
    """One-time parameter prep: pad ragged feature dims and cast weights.

    Do this once and reuse the result across forward calls so each forward pass
    only reads x plus the already-prepared (bf16, padded) weights.
    """
    layers = []
    for (w, b) in params:
        w = jnp.asarray(w, jnp.float32)
        b = jnp.asarray(b, jnp.float32).reshape(1, -1)
        din, dout = w.shape
        din_p, dout_p = _pad_feature_dim(din), _pad_feature_dim(dout)
        if (din_p, dout_p) != (din, dout):
            # Zero padding is exact through Linear + LeakyReLU (padded columns
            # stay identically zero) and is sliced off after the kernel.
            w = jnp.zeros((din_p, dout_p), jnp.float32).at[:din, :dout].set(w)
            b = jnp.zeros((1, dout_p), jnp.float32).at[:, :dout].set(b)
        layers.append((w.astype(weight_dtype), b))   # bias stays f32
    return PreppedMLP(
        layers=tuple(layers),
        dim_in=int(params[0][0].shape[0]),
        dim_out=int(params[-1][0].shape[1]),
    )


def _mlp_kernel(x_ref, *refs, n_layers, negative_slope, compute_dtype):
    """Fused MLP on one batch tile.

    refs = (w0, b0, ..., w_{L-1}, b_{L-1}, out_ref). Weights/biases are
    VMEM-resident (constant index_map, single-buffered); the running activation
    `h` stays on-chip for the whole chain.
    """
    o_ref = refs[-1]
    wb = refs[:-1]
    h = x_ref[...].astype(jnp.float32)
    for l in range(n_layers):
        w = wb[2 * l][...]
        b = wb[2 * l + 1][...]          # (1, Dout) f32, broadcast over tile rows
        # bf16 (or f32) into the MXU, f32 accumulate; epilogue on the f32 acc.
        h = jnp.dot(h.astype(compute_dtype), w.astype(compute_dtype),
                    preferred_element_type=jnp.float32) + b
        if l != n_layers - 1:
            h = jnp.where(h >= 0.0, h, negative_slope * h)
    # TODO(synk): for very wide nets (TM*max_D f32 temporaries pressuring VMEM),
    # stage `h` in an explicit pltpu.VMEM scratch instead of the unrolled chain.
    o_ref[...] = h.astype(o_ref.dtype)


def multimodel_forward(prepped, x, *, negative_slope=0.01,
                       compute_dtype=jnp.bfloat16):
    """Fused forward pass. `prepped` comes from prepare_multimodel_params."""
    B, Din = x.shape
    assert Din == prepped.dim_in
    layers = prepped.layers
    n_layers = len(layers)
    Din_p = layers[0][0].shape[0]
    Dout_p = layers[-1][0].shape[1]

    # Batch tile: 256 fills the 256x256 MXU (v6e/v7x) when there is enough batch
    # for >= 2 grid steps (so both v7x TensorCores get work under "parallel");
    # otherwise 128 (1:1 with v5e's 128x128 MXU); tiny batches use one
    # sublane-aligned tile.
    if B >= 512:
        TM = 256
    elif B >= 256:
        TM = 128
    else:
        TM = min(128, _round_up(B, 8))
    Bp = _round_up(B, TM)

    if (Bp, Din_p) != (B, Din):
        x_p = jnp.zeros((Bp, Din_p), jnp.float32).at[:B, :Din].set(x)
    else:
        x_p = x.astype(jnp.float32)

    flat_wb = []
    for (w, b) in layers:
        flat_wb += [w, b]

    # VMEM budget: resident weights/biases, double-buffered x/out tiles, and the
    # per-layer f32 activation temporaries of the unrolled chain (+2x margin).
    wb_bytes = sum(int(np.prod(a.shape)) * a.dtype.itemsize for a in flat_wb)
    max_width = max([Din_p] + [w.shape[1] for (w, _) in layers])
    act_bytes = (n_layers + 1) * TM * max_width * 4
    io_bytes = 2 * TM * (Din_p + Dout_p) * 4
    vmem_needed = wb_bytes + io_bytes + act_bytes
    vmem_limit = int(min(max(2 * vmem_needed, 32 << 20), 64 << 20))
    # TODO(synk): once resident weights approach ~half the per-core VMEM budget
    # (64 MiB on v7x), switch to streaming weight tiles over an "arbitrary" K/N
    # grid axis instead of full residency.

    flops = 2 * Bp * sum(w.shape[0] * w.shape[1] for (w, _) in layers)
    bytes_accessed = (x_p.size * 4 + Bp * Dout_p * 4 + wb_bytes)

    kernel = functools.partial(
        _mlp_kernel, n_layers=n_layers, negative_slope=negative_slope,
        compute_dtype=compute_dtype)

    def _call(single_buffer_weights):
        resident = ({"pipeline_mode": pl.Buffered(1)}
                    if single_buffer_weights else {})
        in_specs = [pl.BlockSpec((TM, Din_p), lambda i: (i, 0))]
        for (w, b) in layers:
            in_specs.append(pl.BlockSpec(w.shape, lambda i: (0, 0), **resident))
            in_specs.append(pl.BlockSpec(b.shape, lambda i: (0, 0), **resident))
        return pl.pallas_call(
            kernel,
            out_shape=jax.ShapeDtypeStruct((Bp, Dout_p), jnp.float32),
            grid=(Bp // TM,),
            in_specs=in_specs,
            out_specs=pl.BlockSpec((TM, Dout_p), lambda i: (i, 0)),
            compiler_params=pltpu.CompilerParams(
                dimension_semantics=("parallel",),
                vmem_limit_bytes=vmem_limit,
            ),
            cost_estimate=pl.CostEstimate(
                flops=flops, transcendentals=0, bytes_accessed=bytes_accessed),
        )(x_p, *flat_wb)

    try:
        out_p = _call(True)    # single-buffered resident weights (preferred)
    except Exception:
        # Some jax versions reject Buffered(1); falling back to default
        # double-buffering is only a VMEM-capacity regression, never correctness.
        out_p = _call(False)

    return out_p[:B, :prepped.dim_out]


def init_multimodel_params(key, dim_in, num_neurons, num_features):
    """Deterministic parameter init mirroring the PyTorch layer structure."""
    num_neurons = np.atleast_1d(num_neurons)
    dims = [(dim_in, int(num_neurons[0]))]
    for i in range(len(num_neurons)):
        if i == len(num_neurons) - 1:
            dims.append((int(num_neurons[i]), int(num_neurons[i])))
        else:
            dims.append((int(num_neurons[i]), int(num_neurons[i + 1])))
    dims.append((int(num_neurons[-1]), int(num_features)))

    params = []
    for (din, dout) in dims:
        key, kw, kb = jax.random.split(key, 3)
        bound = 1.0 / np.sqrt(din)   # same scale as torch.nn.Linear default init
        w = jax.random.uniform(kw, (din, dout), jnp.float32, -bound, bound)
        b = jax.random.uniform(kb, (dout,), jnp.float32, -bound, bound)
        params.append((w, b))
    return params


def multimodel_reference(params, x):
    """Pure-JAX f32 reference for correctness checking."""
    h = x
    n_layers = len(params)
    for idx, (w, b) in enumerate(params):
        h = h @ w + b
        if idx != n_layers - 1:
            h = jnp.where(h >= 0.0, h, 0.01 * h)
    return h


if __name__ == "__main__":
    dim_in = 16
    num_neurons = [32, 32]
    num_features = 8
    batch = 8

    key = jax.random.PRNGKey(0)
    key, kx = jax.random.split(key)
    x = jax.random.normal(kx, (batch, dim_in), jnp.float32)

    params = init_multimodel_params(key, dim_in, num_neurons, num_features)
    ref = multimodel_reference(params, x)

    # Strict check: f32 weights / f32 MXU path against the f32 reference.
    prepped_f32 = prepare_multimodel_params(params, weight_dtype=jnp.float32)
    out_f32 = jax.block_until_ready(
        multimodel_forward(prepped_f32, x, compute_dtype=jnp.float32))
    np.testing.assert_allclose(np.asarray(out_f32), np.asarray(ref),
                               rtol=1e-5, atol=1e-5)

    # Fast path (default): bf16 weights into the MXU, f32 accumulate.
    prepped_bf16 = prepare_multimodel_params(params)   # bf16 weights
    out_bf16 = jax.block_until_ready(multimodel_forward(prepped_bf16, x))
    np.testing.assert_allclose(np.asarray(out_bf16), np.asarray(ref),
                               rtol=5e-2, atol=5e-2)

    print("KERNEL_OK")
</pallas_src>

<mosaic_0001>
module attributes {stable_mosaic.version = 11 : i64} {
  func.func @_mlp_kernel(%arg0: i32, %arg1: memref<8x16xf32, #tpu.memory_space<vmem>>, %arg2: memref<16x32xf32, #tpu.memory_space<vmem>>, %arg3: memref<1x32xf32, #tpu.memory_space<vmem>>, %arg4: memref<32x32xf32, #tpu.memory_space<vmem>>, %arg5: memref<1x32xf32, #tpu.memory_space<vmem>>, %arg6: memref<32x32xf32, #tpu.memory_space<vmem>>, %arg7: memref<1x32xf32, #tpu.memory_space<vmem>>, %arg8: memref<32x8xf32, #tpu.memory_space<vmem>>, %arg9: memref<1x8xf32, #tpu.memory_space<vmem>>, %arg10: memref<8x8xf32, #tpu.memory_space<vmem>>) attributes {dimension_semantics = [#tpu.dimension_semantics<parallel>], iteration_bounds = array<i64: 1>, scalar_prefetch = 0 : i64, scratch_operands = 0 : i64, tpu.core_type = #tpu.core_type<tc>, window_params = [{transform_indices = @transform_0, window_bounds = array<i64: 8, 16>}, {pipeline_mode = #tpu.pipeline_mode<synchronous>, transform_indices = @transform_1, window_bounds = array<i64: 16, 32>}, {pipeline_mode = #tpu.pipeline_mode<synchronous>, transform_indices = @transform_2, window_bounds = array<i64: 1, 32>}, {pipeline_mode = #tpu.pipeline_mode<synchronous>, transform_indices = @transform_3, window_bounds = array<i64: 32, 32>}, {pipeline_mode = #tpu.pipeline_mode<synchronous>, transform_indices = @transform_4, window_bounds = array<i64: 1, 32>}, {pipeline_mode = #tpu.pipeline_mode<synchronous>, transform_indices = @transform_5, window_bounds = array<i64: 32, 32>}, {pipeline_mode = #tpu.pipeline_mode<synchronous>, transform_indices = @transform_6, window_bounds = array<i64: 1, 32>}, {pipeline_mode = #tpu.pipeline_mode<synchronous>, transform_indices = @transform_7, window_bounds = array<i64: 32, 8>}, {pipeline_mode = #tpu.pipeline_mode<synchronous>, transform_indices = @transform_8, window_bounds = array<i64: 1, 8>}, {transform_indices = @transform_9, window_bounds = array<i64: 8, 8>}]} {
    %c0 = arith.constant 0 : index
    %c0_0 = arith.constant 0 : index
    %0 = vector.load %arg1[%c0, %c0_0] : memref<8x16xf32, #tpu.memory_space<vmem>>, vector<8x16xf32>
    %c0_1 = arith.constant 0 : index
    %c0_2 = arith.constant 0 : index
    %1 = vector.load %arg2[%c0_1, %c0_2] : memref<16x32xf32, #tpu.memory_space<vmem>>, vector<16x32xf32>
    %c0_3 = arith.constant 0 : index
    %c0_4 = arith.constant 0 : index
    %2 = vector.load %arg3[%c0_3, %c0_4] : memref<1x32xf32, #tpu.memory_space<vmem>>, vector<1x32xf32>
    %cst = arith.constant dense<0.000000e+00> : vector<8x32xf32>
    %3 = tpu.matmul %0, %1, %cst {dimension_numbers = #tpu.dot_dimension_numbers<[1], [0], [0], [1], [0, 0, 1, 1], [], []>} : vector<8x16xf32>, vector<16x32xf32>, vector<8x32xf32> -> vector<8x32xf32>
    %4 = vector.broadcast %2 : vector<1x32xf32> to vector<8x32xf32>
    %5 = arith.addf %3, %4 : vector<8x32xf32>
    %cst_5 = arith.constant 0.000000e+00 : f32
    %6 = vector.broadcast %cst_5 : f32 to vector<8x32xf32>
    %7 = arith.cmpf oge, %5, %6 : vector<8x32xf32>
    %cst_6 = arith.constant 0.00999999977 : f32
    %8 = vector.broadcast %cst_6 : f32 to vector<8x32xf32>
    %9 = arith.mulf %8, %5 : vector<8x32xf32>
    %10 = arith.select %7, %5, %9 : vector<8x32xi1>, vector<8x32xf32>
    %c0_7 = arith.constant 0 : index
    %c0_8 = arith.constant 0 : index
    %11 = vector.load %arg4[%c0_7, %c0_8] : memref<32x32xf32, #tpu.memory_space<vmem>>, vector<32x32xf32>
    %c0_9 = arith.constant 0 : index
    %c0_10 = arith.constant 0 : index
    %12 = vector.load %arg5[%c0_9, %c0_10] : memref<1x32xf32, #tpu.memory_space<vmem>>, vector<1x32xf32>
    %cst_11 = arith.constant dense<0.000000e+00> : vector<8x32xf32>
    %13 = tpu.matmul %10, %11, %cst_11 {dimension_numbers = #tpu.dot_dimension_numbers<[1], [0], [0], [1], [0, 0, 1, 1], [], []>} : vector<8x32xf32>, vector<32x32xf32>, vector<8x32xf32> -> vector<8x32xf32>
    %14 = vector.broadcast %12 : vector<1x32xf32> to vector<8x32xf32>
    %15 = arith.addf %13, %14 : vector<8x32xf32>
    %cst_12 = arith.constant 0.000000e+00 : f32
    %16 = vector.broadcast %cst_12 : f32 to vector<8x32xf32>
    %17 = arith.cmpf oge, %15, %16 : vector<8x32xf32>
    %cst_13 = arith.constant 0.00999999977 : f32
    %18 = vector.broadcast %cst_13 : f32 to vector<8x32xf32>
    %19 = arith.mulf %18, %15 : vector<8x32xf32>
    %20 = arith.select %17, %15, %19 : vector<8x32xi1>, vector<8x32xf32>
    %c0_14 = arith.constant 0 : index
    %c0_15 = arith.constant 0 : index
    %21 = vector.load %arg6[%c0_14, %c0_15] : memref<32x32xf32, #tpu.memory_space<vmem>>, vector<32x32xf32>
    %c0_16 = arith.constant 0 : index
    %c0_17 = arith.constant 0 : index
    %22 = vector.load %arg7[%c0_16, %c0_17] : memref<1x32xf32, #tpu.memory_space<vmem>>, vector<1x32xf32>
    %cst_18 = arith.constant dense<0.000000e+00> : vector<8x32xf32>
    %23 = tpu.matmul %20, %21, %cst_18 {dimension_numbers = #tpu.dot_dimension_numbers<[1], [0], [0], [1], [0, 0, 1, 1], [], []>} : vector<8x32xf32>, vector<32x32xf32>, vector<8x32xf32> -> vector<8x32xf32>
    %24 = vector.broadcast %22 : vector<1x32xf32> to vector<8x32xf32>
    %25 = arith.addf %23, %24 : vector<8x32xf32>
    %cst_19 = arith.constant 0.000000e+00 : f32
    %26 = vector.broadcast %cst_19 : f32 to vector<8x32xf32>
    %27 = arith.cmpf oge, %25, %26 : vector<8x32xf32>
    %cst_20 = arith.constant 0.00999999977 : f32
    %28 = vector.broadcast %cst_20 : f32 to vector<8x32xf32>
    %29 = arith.mulf %28, %25 : vector<8x32xf32>
    %30 = arith.select %27, %25, %29 : vector<8x32xi1>, vector<8x32xf32>
    %c0_21 = arith.constant 0 : index
    %c0_22 = arith.constant 0 : index
    %31 = vector.load %arg8[%c0_21, %c0_22] : memref<32x8xf32, #tpu.memory_space<vmem>>, vector<32x8xf32>
    %c0_23 = arith.constant 0 : index
    %c0_24 = arith.constant 0 : index
    %32 = vector.load %arg9[%c0_23, %c0_24] : memref<1x8xf32, #tpu.memory_space<vmem>>, vector<1x8xf32>
    %cst_25 = arith.constant dense<0.000000e+00> : vector<8x8xf32>
    %33 = tpu.matmul %30, %31, %cst_25 {dimension_numbers = #tpu.dot_dimension_numbers<[1], [0], [0], [1], [0, 0, 1, 1], [], []>} : vector<8x32xf32>, vector<32x8xf32>, vector<8x8xf32> -> vector<8x8xf32>
    %34 = vector.broadcast %32 : vector<1x8xf32> to vector<8x8xf32>
    %35 = arith.addf %33, %34 : vector<8x8xf32>
    %c0_26 = arith.constant 0 : index
    %c0_27 = arith.constant 0 : index
    %36 = vector.load %arg10[%c0_26, %c0_27] : memref<8x8xf32, #tpu.memory_space<vmem>>, vector<8x8xf32>
    tpu.vector_store %arg10[%c0_26, %c0_27], %35 {strides = array<i32>} : memref<8x8xf32, #tpu.memory_space<vmem>>, vector<8x8xf32>,
    return
  }
  func.func @transform_0(%arg0: i32) -> (i32, i32) {
    %c0_i32 = arith.constant 0 : i32
    %c0_i32_0 = arith.constant 0 : i32
    return %arg0, %c0_i32 : i32, i32
  }
  func.func @transform_1(%arg0: i32) -> (i32, i32) {
    %c0_i32 = arith.constant 0 : i32
    %c0_i32_0 = arith.constant 0 : i32
    %c0_i32_1 = arith.constant 0 : i32
    return %c0_i32, %c0_i32_0 : i32, i32
  }
  func.func @transform_2(%arg0: i32) -> (i32, i32) {
    %c0_i32 = arith.constant 0 : i32
    %c0_i32_0 = arith.constant 0 : i32
    %c0_i32_1 = arith.constant 0 : i32
    return %c0_i32, %c0_i32_0 : i32, i32
  }
  func.func @transform_3(%arg0: i32) -> (i32, i32) {
    %c0_i32 = arith.constant 0 : i32
    %c0_i32_0 = arith.constant 0 : i32
    %c0_i32_1 = arith.constant 0 : i32
    return %c0_i32, %c0_i32_0 : i32, i32
  }
  func.func @transform_4(%arg0: i32) -> (i32, i32) {
    %c0_i32 = arith.constant 0 : i32
    %c0_i32_0 = arith.constant 0 : i32
    %c0_i32_1 = arith.constant 0 : i32
    return %c0_i32, %c0_i32_0 : i32, i32
  }
  func.func @transform_5(%arg0: i32) -> (i32, i32) {
    %c0_i32 = arith.constant 0 : i32
    %c0_i32_0 = arith.constant 0 : i32
    %c0_i32_1 = arith.constant 0 : i32
    return %c0_i32, %c0_i32_0 : i32, i32
  }
  func.func @transform_6(%arg0: i32) -> (i32, i32) {
    %c0_i32 = arith.constant 0 : i32
    %c0_i32_0 = arith.constant 0 : i32
    %c0_i32_1 = arith.constant 0 : i32
    return %c0_i32, %c0_i32_0 : i32, i32
  }
  func.func @transform_7(%arg0: i32) -> (i32, i32) {
    %c0_i32 = arith.constant 0 : i32
    %c0_i32_0 = arith.constant 0 : i32
    %c0_i32_1 = arith.constant 0 : i32
    return %c0_i32, %c0_i32_0 : i32, i32
  }
  func.func @transform_8(%arg0: i32) -> (i32, i32) {
    %c0_i32 = arith.constant 0 : i32
    %c0_i32_0 = arith.constant 0 : i32
    %c0_i32_1 = arith.constant 0 : i32
    return %c0_i32, %c0_i32_0 : i32, i32
  }
  func.func @transform_9(%arg0: i32) -> (i32, i32) {
    %c0_i32 = arith.constant 0 : i32
    %c0_i32_0 = arith.constant 0 : i32
    return %arg0, %c0_i32 : i32, i32
  }
}

module attributes {stable_mosaic.version = 11 : i64} {
  func.func @_mlp_kernel(%arg0: i32, %arg1: memref<8x16xf32, #tpu.memory_space<vmem>>, %arg2: memref<16x32xf32, #tpu.memory_space<vmem>>, %arg3: memref<1x32xf32, #tpu.memory_space<vmem>>, %arg4: memref<32x32xf32, #tpu.memory_space<vmem>>, %arg5: memref<1x32xf32, #tpu.memory_space<vmem>>, %arg6: memref<32x32xf32, #tpu.memory_space<vmem>>, %arg7: memref<1x32xf32, #tpu.memory_space<vmem>>, %arg8: memref<32x8xf32, #tpu.memory_space<vmem>>, %arg9: memref<1x8xf32, #tpu.memory_space<vmem>>, %arg10: memref<8x8xf32, #tpu.memory_space<vmem>>) attributes {dimension_semantics = [#tpu.dimension_semantics<parallel>], iteration_bounds = array<i64: 1>, scalar_prefetch = 0 : i64, scratch_operands = 0 : i64, tpu.core_type = #tpu.core_type<tc>, window_params = [{transform_indices = @transform_0, window_bounds = array<i64: 8, 16>}, {pipeline_mode = #tpu.pipeline_mode<synchronous>, transform_indices = @transform_1, window_bounds = array<i64: 16, 32>}, {pipeline_mode = #tpu.pipeline_mode<synchronous>, transform_indices = @transform_2, window_bounds = array<i64: 1, 32>}, {pipeline_mode = #tpu.pipeline_mode<synchronous>, transform_indices = @transform_3, window_bounds = array<i64: 32, 32>}, {pipeline_mode = #tpu.pipeline_mode<synchronous>, transform_indices = @transform_4, window_bounds = array<i64: 1, 32>}, {pipeline_mode = #tpu.pipeline_mode<synchronous>, transform_indices = @transform_5, window_bounds = array<i64: 32, 32>}, {pipeline_mode = #tpu.pipeline_mode<synchronous>, transform_indices = @transform_6, window_bounds = array<i64: 1, 32>}, {pipeline_mode = #tpu.pipeline_mode<synchronous>, transform_indices = @transform_7, window_bounds = array<i64: 32, 8>}, {pipeline_mode = #tpu.pipeline_mode<synchronous>, transform_indices = @transform_8, window_bounds = array<i64: 1, 8>}, {transform_indices = @transform_9, window_bounds = array<i64: 8, 8>}]} {
    %c0 = arith.constant 0 : index
    %c0_0 = arith.constant 0 : index
    %0 = vector.load %arg1[%c0, %c0_0] : memref<8x16xf32, #tpu.memory_space<vmem>>, vector<8x16xf32>
    %c0_1 = arith.constant 0 : index
    %c0_2 = arith.constant 0 : index
    %1 = vector.load %arg2[%c0_1, %c0_2] : memref<16x32xf32, #tpu.memory_space<vmem>>, vector<16x32xf32>
    %c0_3 = arith.constant 0 : index
    %c0_4 = arith.constant 0 : index
    %2 = vector.load %arg3[%c0_3, %c0_4] : memref<1x32xf32, #tpu.memory_space<vmem>>, vector<1x32xf32>
    %cst = arith.constant dense<0.000000e+00> : vector<8x32xf32>
    %3 = tpu.matmul %0, %1, %cst {dimension_numbers = #tpu.dot_dimension_numbers<[1], [0], [0], [1], [0, 0, 1, 1], [], []>} : vector<8x16xf32>, vector<16x32xf32>, vector<8x32xf32> -> vector<8x32xf32>
    %4 = vector.broadcast %2 : vector<1x32xf32> to vector<8x32xf32>
    %5 = arith.addf %3, %4 : vector<8x32xf32>
    %cst_5 = arith.constant 0.000000e+00 : f32
    %6 = vector.broadcast %cst_5 : f32 to vector<8x32xf32>
    %7 = arith.cmpf oge, %5, %6 : vector<8x32xf32>
    %cst_6 = arith.constant 0.00999999977 : f32
    %8 = vector.broadcast %cst_6 : f32 to vector<8x32xf32>
    %9 = arith.mulf %8, %5 : vector<8x32xf32>
    %10 = arith.select %7, %5, %9 : vector<8x32xi1>, vector<8x32xf32>
    %c0_7 = arith.constant 0 : index
    %c0_8 = arith.constant 0 : index
    %11 = vector.load %arg4[%c0_7, %c0_8] : memref<32x32xf32, #tpu.memory_space<vmem>>, vector<32x32xf32>
    %c0_9 = arith.constant 0 : index
    %c0_10 = arith.constant 0 : index
    %12 = vector.load %arg5[%c0_9, %c0_10] : memref<1x32xf32, #tpu.memory_space<vmem>>, vector<1x32xf32>
    %cst_11 = arith.constant dense<0.000000e+00> : vector<8x32xf32>
    %13 = tpu.matmul %10, %11, %cst_11 {dimension_numbers = #tpu.dot_dimension_numbers<[1], [0], [0], [1], [0, 0, 1, 1], [], []>} : vector<8x32xf32>, vector<32x32xf32>, vector<8x32xf32> -> vector<8x32xf32>
    %14 = vector.broadcast %12 : vector<1x32xf32> to vector<8x32xf32>
    %15 = arith.addf %13, %14 : vector<8x32xf32>
    %cst_12 = arith.constant 0.000000e+00 : f32
    %16 = vector.broadcast %cst_12 : f32 to vector<8x32xf32>
    %17 = arith.cmpf oge, %15, %16 : vector<8x32xf32>
    %cst_13 = arith.constant 0.00999999977 : f32
    %18 = vector.broadcast %cst_13 : f32 to vector<8x32xf32>
    %19 = arith.mulf %18, %15 : vector<8x32xf32>
    %20 = arith.select %17, %15, %19 : vector<8x32xi1>, vector<8x32xf32>
    %c0_14 = arith.constant 0 : index
    %c0_15 = arith.constant 0 : index
    %21 = vector.load %arg6[%c0_14, %c0_15] : memref<32x32xf32, #tpu.memory_space<vmem>>, vector<32x32xf32>
    %c0_16 = arith.constant 0 : index
    %c0_17 = arith.constant 0 : index
    %22 = vector.load %arg7[%c0_16, %c0_17] : memref<1x32xf32, #tpu.memory_space<vmem>>, vector<1x32xf32>
    %cst_18 = arith.constant dense<0.000000e+00> : vector<8x32xf32>
    %23 = tpu.matmul %20, %21, %cst_18 {dimension_numbers = #tpu.dot_dimension_numbers<[1], [0], [0], [1], [0, 0, 1, 1], [], []>} : vector<8x32xf32>, vector<32x32xf32>, vector<8x32xf32> -> vector<8x32xf32>
    %24 = vector.broadcast %22 : vector<1x32xf32> to vector<8x32xf32>
    %25 = arith.addf %23, %24 : vector<8x32xf32>
    %cst_19 = arith.constant 0.000000e+00 : f32
    %26 = vector.broadcast %cst_19 : f32 to vector<8x32xf32>
    %27 = arith.cmpf oge, %25, %26 : vector<8x32xf32>
    %cst_20 = arith.constant 0.00999999977 : f32
    %28 = vector.broadcast %cst_20 : f32 to vector<8x32xf32>
    %29 = arith.mulf %28, %25 : vector<8x32xf32>
    %30 = arith.select %27, %25, %29 : vector<8x32xi1>, vector<8x32xf32>
    %c0_21 = arith.constant 0 : index
    %c0_22 = arith.constant 0 : index
    %31 = vector.load %arg8[%c0_21, %c0_22] : memref<32x8xf32, #tpu.memory_space<vmem>>, vector<32x8xf32>
    %c0_23 = arith.constant 0 : index
    %c0_24 = arith.constant 0 : index
    %32 = vector.load %arg9[%c0_23, %c0_24] : memref<1x8xf32, #tpu.memory_space<vmem>>, vector<1x8xf32>
    %cst_25 = arith.constant dense<0.000000e+00> : vector<8x8xf32>
    %33 = tpu.matmul %30, %31, %cst_25 {dimension_numbers = #tpu.dot_dimension_numbers<[1], [0], [0], [1], [0, 0, 1, 1], [], []>} : vector<8x32xf32>, vector<32x8xf32>, vector<8x8xf32> -> vector<8x8xf32>
    %34 = vector.broadcast %32 : vector<1x8xf32> to vector<8x8xf32>
    %35 = arith.addf %33, %34 : vector<8x8xf32>
    %c0_26 = arith.constant 0 : index
    %c0_27 = arith.constant 0 : index
    %36 = vector.load %arg10[%c0_26, %c0_27] : memref<8x8xf32, #tpu.memory_space<vmem>>, vector<8x8xf32>
    tpu.vector_store %arg10[%c0_26, %c0_27], %35 {strides = array<i32>} : memref<8x8xf32, #tpu.memory_space<vmem>>, vector<8x8xf32>,
    return
  }
  func.func @transform_0(%arg0: i32) -> (i32, i32) {
    %c0_i32 = arith.constant 0 : i32
    %c0_i32_0 = arith.constant 0 : i32
    return %arg0, %c0_i32 : i32, i32
  }
  func.func @transform_1(%arg0: i32) -> (i32, i32) {
    %c0_i32 = arith.constant 0 : i32
    %c0_i32_0 = arith.constant 0 : i32
    %c0_i32_1 = arith.constant 0 : i32
    return %c0_i32, %c0_i32_0 : i32, i32
  }
  func.func @transform_2(%arg0: i32) -> (i32, i32) {
    %c0_i32 = arith.constant 0 : i32
    %c0_i32_0 = arith.constant 0 : i32
    %c0_i32_1 = arith.constant 0 : i32
    return %c0_i32, %c0_i32_0 : i32, i32
  }
  func.func @transform_3(%arg0: i32) -> (i32, i32) {
    %c0_i32 = arith.constant 0 : i32
    %c0_i32_0 = arith.constant 0 : i32
    %c0_i32_1 = arith.constant 0 : i32
    return %c0_i32, %c0_i32_0 : i32, i32
  }
  func.func @transform_4(%arg0: i32) -> (i32, i32) {
    %c0_i32 = arith.constant 0 : i32
    %c0_i32_0 = arith.constant 0 : i32
    %c0_i32_1 = arith.constant 0 : i32
    return %c0_i32, %c0_i32_0 : i32, i32
  }
  func.func @transform_5(%arg0: i32) -> (i32, i32) {
    %c0_i32 = arith.constant 0 : i32
    %c0_i32_0 = arith.constant 0 : i32
    %c0_i32_1 = arith.constant 0 : i32
    return %c0_i32, %c0_i32_0 : i32, i32
  }
  func.func @transform_6(%arg0: i32) -> (i32, i32) {
    %c0_i32 = arith.constant 0 : i32
    %c0_i32_0 = arith.constant 0 : i32
    %c0_i32_1 = arith.constant 0 : i32
    return %c0_i32, %c0_i32_0 : i32, i32
  }
  func.func @transform_7(%arg0: i32) -> (i32, i32) {
    %c0_i32 = arith.constant 0 : i32
    %c0_i32_0 = arith.constant 0 : i32
    %c0_i32_1 = arith.constant 0 : i32
    return %c0_i32, %c0_i32_0 : i32, i32
  }
  func.func @transform_8(%arg0: i32) -> (i32, i32) {
    %c0_i32 = arith.constant 0 : i32
    %c0_i32_0 = arith.constant 0 : i32
    %c0_i32_1 = arith.constant 0 : i32
    return %c0_i32, %c0_i32_0 : i32, i32
  }
  func.func @transform_9(%arg0: i32) -> (i32, i32) {
    %c0_i32 = arith.constant 0 : i32
    %c0_i32_0 = arith.constant 0 : i32
    return %arg0, %c0_i32 : i32, i32
  }
}

</mosaic_0001>

<bundles_post_ra>
// kernel: tpu_custom_call.1
= control target key start
LH: loop header
LB: loop body
LE: loop exit
PB: predicated region body
PF: predicated region fallthrough
CT: control target
= control target key end

     0   :  { %14 = vsyncpa [#allocation3], 0  ;;  %s740_s0 = inlined_call_operand.hbm [shape: f32[8,16], index: 0, kind: input, shape index: {}]   ;;  %s741_s1 = inlined_call_operand.vmem [shape: f32[16,32], index: 1, kind: input, shape index: {}]   ;;  %s742_s2 = inlined_call_operand.vmem [shape: f32[1,32], index: 2, kind: input, shape index: {}]   ;;  %s743_s3 = inlined_call_operand.vmem [shape: f32[32,32], index: 3, kind: input, shape index: {}]   ;;  %s744_s4 = inlined_call_operand.vmem [shape: f32[1,32], index: 4, kind: input, shape index: {}]   ;;  %s745_s5 = inlined_call_operand.hbm [shape: f32[32,32], index: 5, kind: input, shape index: {}]   ;;  %s746_s6 = inlined_call_operand.vmem [shape: f32[1,32], index: 6, kind: input, shape index: {}]   ;;  %s747_s7 = inlined_call_operand.vmem [shape: f32[32,8], index: 7, kind: input, shape index: {}]   ;;  %s748_s8 = inlined_call_operand.vmem [shape: f32[1,8], index: 8, kind: input, shape index: {}]   ;;  %s749_s9 = inlined_call_operand.hbm [shape: f32[8,8], index: 9, kind: output, shape index: {}]  }
   0x1   :  { %15 = vsyncpa [#allocation6], 0 }
   0x2   :  { %16 = vsyncpa [#allocation4], 0  ;;  %s590_s30 = smov [#allocation2]   ;;  %s591_s11 = smov [#allocation5]  }
   0x3   :  { %s23_s10 = sshll.u32 %s590_s30, 4  ;;  %s40_s12 = sshll.u32 %s591_s11, 4  ;;  %s24_s10 = int_to_ptr.vmem [resolvable:$true] %s23_s10  ;;  %s648_s12 = int_to_ptr.vmem [resolvable:$true] %s40_s12 }
   0x4   :  { %s518_s15 = scalar_lea.hbm %s740_s0, 128 }
   0x5   :  { %p519_p0 = scmp.ne.s32.totalorder %s740_s0, %s518_s15  ;;  %p522_p1 = scmp.lt.u32.totalorder %s518_s15, %s740_s0 }
   0x7   :  { %p524_p2 = pnand %p522_p1, %p519_p0 }
   0x9   :  { %527 = shalt.err (!%p524_p2)
}
   0xa   :  { %s528_s20 = scalar_lea.vmem %s24_s10, 128  ;;  %p533_p4 = scmp.lt.s32.totalorder %s24_s10, %s24_s10 }
   0xb   :  { %p529_p3 = scmp.ne.s32.totalorder %s24_s10, %s528_s20  ;;  %p534_p5 = scmp.lt.s32.totalorder %s528_s20, %s528_s20 }
   0xd   :  { %p535_p6 = por %p534_p5, %p533_p4 }
   0xf   :  { %p536_p7 = pnand %p535_p6, %p529_p3 }
  0x11   :  { %539 = shalt.err (!%p536_p7)
}
  0x12   :  { %26 = dma.hbm_to_vmem [thread:$0]  %s740_s0, 128, %s24_s10, [#allocation3]  }
  0x13   :  { %s540_s25 = scalar_lea.hbm %s745_s5, 512 }
  0x14   :  { %p541_p8 = scmp.ne.s32.totalorder %s745_s5, %s540_s25  ;;  %p544_p9 = scmp.lt.u32.totalorder %s540_s25, %s745_s5 }
  0x16   :  { %p546_p10 = pnand %p544_p9, %p541_p8 }
  0x18   :  { %549 = shalt.err (!%p546_p10)
}
  0x19   :  { %s550_s30 = scalar_lea.vmem %s648_s12, 512  ;;  %p555_p12 = scmp.lt.s32.totalorder %s648_s12, %s648_s12 }
  0x1a   :  { %p551_p11 = scmp.ne.s32.totalorder %s648_s12, %s550_s30  ;;  %p556_p13 = scmp.lt.s32.totalorder %s550_s30, %s550_s30 }
  0x1c   :  { %p557_p0 = por %p556_p13, %p555_p12 }
  0x1e   :  { %p558_p1 = pnand %p557_p0, %p551_p11 }
  0x20   :  { %561 = shalt.err (!%p558_p1)
}
  0x21   :  { %s592_s0 = smov 128   ;;  %s593_s10 = smov 8  }
  0x22   :  { %46 = dma.hbm_to_vmem [thread:$0]  %s745_s5, 512, %s648_s12, [#allocation6], %s592_s0, %s592_s0, %s593_s10  }
  0x23   :  { %584 = dma.done.wait [#allocation3], 128  }
  0x24   :  { %585 = vsyncadd [#allocation3], 4294967168 }
  0x25   :  { %586 = dma.done.wait [#allocation6], 512  }
  0x26   :  { %587 = vsyncadd [#allocation6], 4294966784  ;;  %v594_v0 = vmov 0.0|0.0   ;;  %vm595_vm0 = vmmov 0   ;;  %v596_v1 = vmov 0.0   ;;  %v60_v2 = vld [vmem:[%s741_s1] sm:$0xff] }
  0x27   :  { %489 = vmatprep.subr.bf16.mxu0 %v594_v0  ;;  %453 = vmatprep.mubr.msk.f32.mxu0 %vm595_vm0, %v596_v1  ;;  %v61_v3 = vld [vmem:[%s741_s1 + $0x8] sm:$0xff]  ;;  %v146_v5 = vld [vmem:[%s743_s3] sm:$0xff]  ;;  %vm69_vm1 = vcmask 130048   ;;  %v148_v9 = vld [vmem:[%s743_s3 + $0x10] sm:$0xff]  ;;  %vm157_vm3 = vcmask 261120   ;;  %s597_s15 = smov [#allocation7]  }
  0x28   :  { %492 = vmatprep.subr.bf16.mxu1 %v594_v0  ;;  %464 = vmatprep.mubr.msk.f32.mxu1 %vm595_vm0, %v596_v1  ;;  %v490_v4 = vpack.c.bf16 %v61_v3, %v60_v2  ;;  %v147_v6 = vld [vmem:[%s743_s3 + $0x8] sm:$0xff]  ;;  %v59_v8 = vld [vmem:[#allocation2] sm:$0xff]  ;;  %v149_v10 = vld [vmem:[%s743_s3 + $0x18] sm:$0xff]  ;;  %vm405_vm6 = vcmask 64512  }
  0x29   :  { %v493_v7 = vpack.c.bf16 %v147_v6, %v146_v5  ;;  %v496_v11 = vpack.c.bf16 %v149_v10, %v148_v9  ;;  %v234_v12 = vld [vmem:[#allocation5] sm:$0xff]  ;;  %v235_v13 = vld [vmem:[#allocation5 + $0x8] sm:$0xff]  ;;  %v423_v15 = vld [vmem:[%s742_s2] ss:$0 sm:$0xff] }
  0x2a   :  { %491 = vmatpush3.bf16.msra.mxu0 %v490_v4  ;;  %v499_v14 = vpack.c.bf16 %v235_v13, %v234_v12  ;;  %v236_v21 = vld [vmem:[#allocation5 + $0x10] sm:$0xff]  ;;  %v237_v22 = vld [vmem:[#allocation5 + $0x18] sm:$0xff]  ;;  %v322_v25 = vld [vmem:[%s747_s7 + $0x8] sm:$0xff] }
  0x2b   :  { %494 = vmatpush3.bf16.msra.mxu1 %v493_v7  ;;  %498 = vmatprep.subr.bf16.mxu0 %v594_v0  ;;  %v502_v23 = vpack.c.bf16 %v237_v22, %v236_v21  ;;  %v321_v24 = vld [vmem:[%s747_s7] sm:$0xff]  ;;  %v323_v33 = vld [vmem:[%s747_s7 + $0x10] sm:$0xff]  ;;  %v324_v34 = vld [vmem:[%s747_s7 + $0x18] sm:$0xff]  ;;  %s413_s7 = sshll.u32 %s597_s15, 4  ;;  %s414_s7 = int_to_ptr.vmem [resolvable:$true] %s413_s7 }
  0x2c   :  { %495 = vmatprep.subr.bf16.mxu1 %v594_v0  ;;  %v505_v26 = vpack.c.bf16 %v322_v25, %v321_v24  ;;  %v425_v27 = vld [vmem:[%s744_s4] ss:$0 sm:$0xff]  ;;  %v508_v35 = vpack.c.bf16 %v324_v34, %v323_v33  ;;  %p567_p3 = scmp.lt.s32.totalorder %s414_s7, %s414_s7 }
  0x2d   :  { %454 = vmatmul.mubr.msk.f32.vlgmr.msra.gmra.mrb[0].mxu0 %vm69_vm1, %v59_v8  ;;  %v427_v36 = vld [vmem:[%s746_s6] ss:$0 sm:$0xff]  ;;  %s562_s6 = scalar_lea.vmem %s414_s7, 128 }
  0x2e   :  { %475 = vmatprep.mubr.msk.f32.mxu0 %vm595_vm0, %v596_v1  ;;  %500 = vmatpush3.bf16.msra.mxu0 %v499_v14  ;;  %v429_v42 = vld [vmem:[%s748_s8] ss:$0 sm:$0xff]  ;;  %p563_p2 = scmp.ne.s32.totalorder %s414_s7, %s562_s6  ;;  %p568_p4 = scmp.lt.s32.totalorder %s562_s6, %s562_s6 }
  0x2f   :  { %497 = vmatpush3.bf16.msra.mxu1 %v496_v11  ;;  %501 = vmatprep.subr.bf16.mxu0 %v594_v0 }
  0x30   :  { %504 = vmatprep.subr.bf16.mxu1 %v594_v0  ;;  %p569_p5 = por %p568_p4, %p567_p3 }
  0x32   :  { %503 = vmatpush3.bf16.msra.mxu0 %v502_v23  ;;  %p570_p6 = pnand %p569_p5, %p563_p2 }
 0x100   :  { %v139_v16 = vpop.f32.mrb[0].mxu0 }
 0x101   :  { %v140_v17 = vadd.f32 %v423_v15, %v139_v16  ;;  %v455_v18 = vpop.f32.mrb[1].mxu0 }
 0x103   :  { %vm143_vm2 = vcmp.ge.f32.partialorder %v140_v17, 0.0  ;;  %v144_v19 = vmul.f32 0.01, %v140_v17 }
 0x105   :  { %v145_v20 = vsel %vm143_vm2, %v140_v17, %v144_v19 }
 0x106   :  { %465 = vmatmul.mubr.msk.f32.vlgmr.msra.gmra.mrb[0].mxu1 %vm157_vm3, %v145_v20 }
 0x107   :  { %486 = vmatprep.mubr.msk.f32.mxu1 %vm595_vm0, %v596_v1  ;;  %506 = vmatpush3.bf16.msra.mxu1 %v505_v26 }
 0x108   :  { %507 = vmatprep.subr.bf16.mxu1 %v594_v0 }
 0x10b   :  { %509 = vmatpush3.bf16.msra.mxu1 %v508_v35 }
 0x1d9   :  { %v227_v28 = vpop.f32.mrb[0].mxu1 }
 0x1da   :  { %v228_v29 = vadd.f32 %v425_v27, %v227_v28  ;;  %v466_v30 = vpop.f32.mrb[1].mxu1 }
 0x1dc   :  { %vm231_vm4 = vcmp.ge.f32.partialorder %v228_v29, 0.0  ;;  %v232_v31 = vmul.f32 0.01, %v228_v29 }
 0x1de   :  { %v233_v32 = vsel %vm231_vm4, %v228_v29, %v232_v31 }
 0x1df   :  { %476 = vmatmul.mubr.msk.f32.vlgmr.msra.gmra.mrb[2].mxu0 %vm157_vm3, %v233_v32 }
 0x2b2   :  { %v314_v37 = vpop.f32.mrb[2].mxu0 }
 0x2b3   :  { %v315_v38 = vadd.f32 %v427_v36, %v314_v37  ;;  %v477_v39 = vpop.f32.mrb[3].mxu0 }
 0x2b5   :  { %vm318_vm5 = vcmp.ge.f32.partialorder %v315_v38, 0.0  ;;  %v319_v40 = vmul.f32 0.01, %v315_v38 }
 0x2b7   :  { %v320_v41 = vsel %vm318_vm5, %v315_v38, %v319_v40 }
 0x2b8   :  { %487 = vmatmul.mubr.msk.f32.vlgmr.msra.gmra.mrb[2].mxu1 %vm157_vm3, %v320_v41 }
 0x38b   :  { %v401_v43 = vpop.f32.mrb[2].mxu1 }
 0x38c   :  { %v402_v44 = vadd.f32 %v429_v42, %v401_v43  ;;  %v488_v45 = vpop.f32.mrb[3].mxu1 }
 0x38e   :  { %406 = vst.msk [vmem:[#allocation7] sm:$0xff] %vm405_vm6, %v402_v44 }
 0x38f   :  { %573 = shalt.err (!%p570_p6)
}
 0x390   :  { %s574_s5 = scalar_lea.hbm %s749_s9, 128 }
 0x391   :  { %p575_p7 = scmp.ne.s32.totalorder %s749_s9, %s574_s5  ;;  %p578_p8 = scmp.lt.u32.totalorder %s574_s5, %s749_s9 }
 0x393   :  { %p580_p9 = pnand %p578_p8, %p575_p7 }
 0x395   :  { %583 = shalt.err (!%p580_p9)
}
 0x396   :  { %416 = dma.vmem_to_hbm [thread:$0]  %s414_s7, 128, %s749_s9, [#allocation4]  }
 0x397   :  { %588 = dma.done.wait [#allocation4], 128  }
 0x398   :  { %589 = vsyncadd [#allocation4], 4294967168 }
 0x399   :  { %420 = vsyncpa [#allocation3], 1 }
 0x39a   :  { %421 = vsyncpa [#allocation6], 1 }
 0x39b   :  { %422 = vsyncpa [#allocation4], 1 }

// kernel: tpu_custom_call.1
= control target key start
LH: loop header
LB: loop body
LE: loop exit
PB: predicated region body
PF: predicated region fallthrough
CT: control target
= control target key end

     0   :  { %14 = vsyncpa [#allocation3], 0  ;;  %s740_s0 = inlined_call_operand.hbm [shape: f32[8,16], index: 0, kind: input, shape index: {}]   ;;  %s741_s1 = inlined_call_operand.vmem [shape: f32[16,32], index: 1, kind: input, shape index: {}]   ;;  %s742_s2 = inlined_call_operand.vmem [shape: f32[1,32], index: 2, kind: input, shape index: {}]   ;;  %s743_s3 = inlined_call_operand.vmem [shape: f32[32,32], index: 3, kind: input, shape index: {}]   ;;  %s744_s4 = inlined_call_operand.vmem [shape: f32[1,32], index: 4, kind: input, shape index: {}]   ;;  %s745_s5 = inlined_call_operand.hbm [shape: f32[32,32], index: 5, kind: input, shape index: {}]   ;;  %s746_s6 = inlined_call_operand.vmem [shape: f32[1,32], index: 6, kind: input, shape index: {}]   ;;  %s747_s7 = inlined_call_operand.vmem [shape: f32[32,8], index: 7, kind: input, shape index: {}]   ;;  %s748_s8 = inlined_call_operand.vmem [shape: f32[1,8], index: 8, kind: input, shape index: {}]   ;;  %s749_s9 = inlined_call_operand.hbm [shape: f32[8,8], index: 9, kind: output, shape index: {}]  }
   0x1   :  { %15 = vsyncpa [#allocation6], 0 }
   0x2   :  { %16 = vsyncpa [#allocation4], 0  ;;  %s590_s30 = smov [#allocation2]   ;;  %s591_s11 = smov [#allocation5]  }
   0x3   :  { %s23_s10 = sshll.u32 %s590_s30, 4  ;;  %s40_s12 = sshll.u32 %s591_s11, 4  ;;  %s24_s10 = int_to_ptr.vmem [resolvable:$true] %s23_s10  ;;  %s648_s12 = int_to_ptr.vmem [resolvable:$true] %s40_s12 }
   0x4   :  { %s518_s15 = scalar_lea.hbm %s740_s0, 128 }
   0x5   :  { %p519_p0 = scmp.ne.s32.totalorder %s740_s0, %s518_s15  ;;  %p522_p1 = scmp.lt.u32.totalorder %s518_s15, %s740_s0 }
   0x7   :  { %p524_p2 = pnand %p522_p1, %p519_p0 }
   0x9   :  { %527 = shalt.err (!%p524_p2)
}
   0xa   :  { %s528_s20 = scalar_lea.vmem %s24_s10, 128  ;;  %p533_p4 = scmp.lt.s32.totalorder %s24_s10, %s24_s10 }
   0xb   :  { %p529_p3 = scmp.ne.s32.totalorder %s24_s10, %s528_s20  ;;  %p534_p5 = scmp.lt.s32.totalorder %s528_s20, %s528_s20 }
   0xd   :  { %p535_p6 = por %p534_p5, %p533_p4 }
   0xf   :  { %p536_p7 = pnand %p535_p6, %p529_p3 }
  0x11   :  { %539 = shalt.err (!%p536_p7)
}
  0x12   :  { %26 = dma.hbm_to_vmem [thread:$0]  %s740_s0, 128, %s24_s10, [#allocation3]  }
  0x13   :  { %s540_s25 = scalar_lea.hbm %s745_s5, 512 }
  0x14   :  { %p541_p8 = scmp.ne.s32.totalorder %s745_s5, %s540_s25  ;;  %p544_p9 = scmp.lt.u32.totalorder %s540_s25, %s745_s5 }
  0x16   :  { %p546_p10 = pnand %p544_p9, %p541_p8 }
  0x18   :  { %549 = shalt.err (!%p546_p10)
}
  0x19   :  { %s550_s30 = scalar_lea.vmem %s648_s12, 512  ;;  %p555_p12 = scmp.lt.s32.totalorder %s648_s12, %s648_s12 }
  0x1a   :  { %p551_p11 = scmp.ne.s32.totalorder %s648_s12, %s550_s30  ;;  %p556_p13 = scmp.lt.s32.totalorder %s550_s30, %s550_s30 }
  0x1c   :  { %p557_p0 = por %p556_p13, %p555_p12 }
  0x1e   :  { %p558_p1 = pnand %p557_p0, %p551_p11 }
  0x20   :  { %561 = shalt.err (!%p558_p1)
}
  0x21   :  { %s592_s0 = smov 128   ;;  %s593_s10 = smov 8  }
  0x22   :  { %46 = dma.hbm_to_vmem [thread:$0]  %s745_s5, 512, %s648_s12, [#allocation6], %s592_s0, %s592_s0, %s593_s10  }
  0x23   :  { %584 = dma.done.wait [#allocation3], 128  }
  0x24   :  { %585 = vsyncadd [#allocation3], 4294967168 }
  0x25   :  { %586 = dma.done.wait [#allocation6], 512  }
  0x26   :  { %587 = vsyncadd [#allocation6], 4294966784  ;;  %v594_v0 = vmov 0.0|0.0   ;;  %vm595_vm0 = vmmov 0   ;;  %v596_v1 = vmov 0.0   ;;  %v60_v2 = vld [vmem:[%s741_s1] sm:$0xff] }
  0x27   :  { %489 = vmatprep.subr.bf16.mxu0 %v594_v0  ;;  %453 = vmatprep.mubr.msk.f32.mxu0 %vm595_vm0, %v596_v1  ;;  %v61_v3 = vld [vmem:[%s741_s1 + $0x8] sm:$0xff]  ;;  %v146_v5 = vld [vmem:[%s743_s3] sm:$0xff]  ;;  %vm69_vm1 = vcmask 130048   ;;  %v148_v9 = vld [vmem:[%s743_s3 + $0x10] sm:$0xff]  ;;  %vm157_vm3 = vcmask 261120   ;;  %s597_s15 = smov [#allocation7]  }
  0x28   :  { %492 = vmatprep.subr.bf16.mxu1 %v594_v0  ;;  %464 = vmatprep.mubr.msk.f32.mxu1 %vm595_vm0, %v596_v1  ;;  %v490_v4 = vpack.c.bf16 %v61_v3, %v60_v2  ;;  %v147_v6 = vld [vmem:[%s743_s3 + $0x8] sm:$0xff]  ;;  %v59_v8 = vld [vmem:[#allocation2] sm:$0xff]  ;;  %v149_v10 = vld [vmem:[%s743_s3 + $0x18] sm:$0xff]  ;;  %vm405_vm6 = vcmask 64512  }
  0x29   :  { %v493_v7 = vpack.c.bf16 %v147_v6, %v146_v5  ;;  %v496_v11 = vpack.c.bf16 %v149_v10, %v148_v9  ;;  %v234_v12 = vld [vmem:[#allocation5] sm:$0xff]  ;;  %v235_v13 = vld [vmem:[#allocation5 + $0x8] sm:$0xff]  ;;  %v423_v15 = vld [vmem:[%s742_s2] ss:$0 sm:$0xff] }
  0x2a   :  { %491 = vmatpush3.bf16.msra.mxu0 %v490_v4  ;;  %v499_v14 = vpack.c.bf16 %v235_v13, %v234_v12  ;;  %v236_v21 = vld [vmem:[#allocation5 + $0x10] sm:$0xff]  ;;  %v237_v22 = vld [vmem:[#allocation5 + $0x18] sm:$0xff]  ;;  %v322_v25 = vld [vmem:[%s747_s7 + $0x8] sm:$0xff] }
  0x2b   :  { %494 = vmatpush3.bf16.msra.mxu1 %v493_v7  ;;  %498 = vmatprep.subr.bf16.mxu0 %v594_v0  ;;  %v502_v23 = vpack.c.bf16 %v237_v22, %v236_v21  ;;  %v321_v24 = vld [vmem:[%s747_s7] sm:$0xff]  ;;  %v323_v33 = vld [vmem:[%s747_s7 + $0x10] sm:$0xff]  ;;  %v324_v34 = vld [vmem:[%s747_s7 + $0x18] sm:$0xff]  ;;  %s413_s7 = sshll.u32 %s597_s15, 4  ;;  %s414_s7 = int_to_ptr.vmem [resolvable:$true] %s413_s7 }
  0x2c   :  { %495 = vmatprep.subr.bf16.mxu1 %v594_v0  ;;  %v505_v26 = vpack.c.bf16 %v322_v25, %v321_v24  ;;  %v425_v27 = vld [vmem:[%s744_s4] ss:$0 sm:$0xff]  ;;  %v508_v35 = vpack.c.bf16 %v324_v34, %v323_v33  ;;  %p567_p3 = scmp.lt.s32.totalorder %s414_s7, %s414_s7 }
  0x2d   :  { %454 = vmatmul.mubr.msk.f32.vlgmr.msra.gmra.mrb[0].mxu0 %vm69_vm1, %v59_v8  ;;  %v427_v36 = vld [vmem:[%s746_s6] ss:$0 sm:$0xff]  ;;  %s562_s6 = scalar_lea.vmem %s414_s7, 128 }
  0x2e   :  { %475 = vmatprep.mubr.msk.f32.mxu0 %vm595_vm0, %v596_v1  ;;  %500 = vmatpush3.bf16.msra.mxu0 %v499_v14  ;;  %v429_v42 = vld [vmem:[%s748_s8] ss:$0 sm:$0xff]  ;;  %p563_p2 = scmp.ne.s32.totalorder %s414_s7, %s562_s6  ;;  %p568_p4 = scmp.lt.s32.totalorder %s562_s6, %s562_s6 }
  0x2f   :  { %497 = vmatpush3.bf16.msra.mxu1 %v496_v11  ;;  %501 = vmatprep.subr.bf16.mxu0 %v594_v0 }
  0x30   :  { %504 = vmatprep.subr.bf16.mxu1 %v594_v0  ;;  %p569_p5 = por %p568_p4, %p567_p3 }
  0x32   :  { %503 = vmatpush3.bf16.msra.mxu0 %v502_v23  ;;  %p570_p6 = pnand %p569_p5, %p563_p2 }
 0x100   :  { %v139_v16 = vpop.f32.mrb[0].mxu0 }
 0x101   :  { %v140_v17 = vadd.f32 %v423_v15, %v139_v16  ;;  %v455_v18 = vpop.f32.mrb[1].mxu0 }
 0x103   :  { %vm143_vm2 = vcmp.ge.f32.partialorder %v140_v17, 0.0  ;;  %v144_v19 = vmul.f32 0.01, %v140_v17 }
 0x105   :  { %v145_v20 = vsel %vm143_vm2, %v140_v17, %v144_v19 }
 0x106   :  { %465 = vmatmul.mubr.msk.f32.vlgmr.msra.gmra.mrb[0].mxu1 %vm157_vm3, %v145_v20 }
 0x107   :  { %486 = vmatprep.mubr.msk.f32.mxu1 %vm595_vm0, %v596_v1  ;;  %506 = vmatpush3.bf16.msra.mxu1 %v505_v26 }
 0x108   :  { %507 = vmatprep.subr.bf16.mxu1 %v594_v0 }
 0x10b   :  { %509 = vmatpush3.bf16.msra.mxu1 %v508_v35 }
 0x1d9   :  { %v227_v28 = vpop.f32.mrb[0].mxu1 }
 0x1da   :  { %v228_v29 = vadd.f32 %v425_v27, %v227_v28  ;;  %v466_v30 = vpop.f32.mrb[1].mxu1 }
 0x1dc   :  { %vm231_vm4 = vcmp.ge.f32.partialorder %v228_v29, 0.0  ;;  %v232_v31 = vmul.f32 0.01, %v228_v29 }
 0x1de   :  { %v233_v32 = vsel %vm231_vm4, %v228_v29, %v232_v31 }
 0x1df   :  { %476 = vmatmul.mubr.msk.f32.vlgmr.msra.gmra.mrb[2].mxu0 %vm157_vm3, %v233_v32 }
 0x2b2   :  { %v314_v37 = vpop.f32.mrb[2].mxu0 }
 0x2b3   :  { %v315_v38 = vadd.f32 %v427_v36, %v314_v37  ;;  %v477_v39 = vpop.f32.mrb[3].mxu0 }
 0x2b5   :  { %vm318_vm5 = vcmp.ge.f32.partialorder %v315_v38, 0.0  ;;  %v319_v40 = vmul.f32 0.01, %v315_v38 }
 0x2b7   :  { %v320_v41 = vsel %vm318_vm5, %v315_v38, %v319_v40 }
 0x2b8   :  { %487 = vmatmul.mubr.msk.f32.vlgmr.msra.gmra.mrb[2].mxu1 %vm157_vm3, %v320_v41 }
 0x38b   :  { %v401_v43 = vpop.f32.mrb[2].mxu1 }
 0x38c   :  { %v402_v44 = vadd.f32 %v429_v42, %v401_v43  ;;  %v488_v45 = vpop.f32.mrb[3].mxu1 }
 0x38e   :  { %406 = vst.msk [vmem:[#allocation7] sm:$0xff] %vm405_vm6, %v402_v44 }
 0x38f   :  { %573 = shalt.err (!%p570_p6)
}
 0x390   :  { %s574_s5 = scalar_lea.hbm %s749_s9, 128 }
 0x391   :  { %p575_p7 = scmp.ne.s32.totalorder %s749_s9, %s574_s5  ;;  %p578_p8 = scmp.lt.u32.totalorder %s574_s5, %s749_s9 }
 0x393   :  { %p580_p9 = pnand %p578_p8, %p575_p7 }
 0x395   :  { %583 = shalt.err (!%p580_p9)
}
 0x396   :  { %416 = dma.vmem_to_hbm [thread:$0]  %s414_s7, 128, %s749_s9, [#allocation4]  }
 0x397   :  { %588 = dma.done.wait [#allocation4], 128  }
 0x398   :  { %589 = vsyncadd [#allocation4], 4294967168 }
 0x399   :  { %420 = vsyncpa [#allocation3], 1 }
 0x39a   :  { %421 = vsyncpa [#allocation6], 1 }
 0x39b   :  { %422 = vsyncpa [#allocation4], 1 }

</bundles_post_ra>
